<compile_context>
chip_gen: v6e
topology: v6e:2x2x1
jax: 0.10.0
libtpu: 0.0.40
codegen_flags: <defaults>
</compile_context>

<pallas_src>
import math
import numpy as np
import jax
import jax.numpy as jnp
from jax import lax
from jax.experimental import pallas as pl
from jax.experimental.pallas import tpu as pltpu


def _round_up(a, b):
    return (a + b - 1) // b * b


def _make_scatter_mean_kernel(C, tv):
    """Kernel body closed over the static channel count C and voxel-tile width tv."""

    def kernel(vt_ref, src_ref, first_ref, valid_ref, last_ref, feat_ref, out_ref):
        # grid = (T_bound,): one step per (padded) point tile, sorted & grouped by voxel tile.
        k = pl.program_id(0)

        @pl.when(first_ref[k] == 1)          # first point tile of this voxel tile -> zero acc
        def _init():
            out_ref[...] = jnp.zeros_like(out_ref)

        @pl.when(valid_ref[k] == 1)          # real (non-padding) point tile -> accumulate
        def _accum():
            f = feat_ref[...]                                      # (c_sub, TN) f32
            vid_row = f[C + 1:C + 2, :]                            # (1, TN) voxel id as float, -1 = pad
            rows_col = (vt_ref[k] * tv +
                        lax.broadcasted_iota(jnp.int32, (tv, 1), 0)).astype(jnp.float32)
            mask = (vid_row == rows_col).astype(jnp.float32)       # (TV, TN) one-hot membership
            # out (c_sub, TV) += f (c_sub, TN) @ mask.T  -- contract over points on the MXU.
            out_ref[...] += lax.dot_general(
                f, mask,
                dimension_numbers=(((1,), (1,)), ((), ())),
                preferred_element_type=jnp.float32)

        @pl.when(last_ref[k] == 1)           # last point tile of this voxel tile -> finalize mean
        def _finalize():
            acc = out_ref[...]
            cnt = acc[C:C + 1, :]                                  # (1, TV) per-voxel point counts
            out_ref[...] = acc * (1.0 / jnp.maximum(cnt, 1.0))     # exact divide; extra rows unused

    return kernel


class DynamicSimpleVFE:
    """JAX/Pallas port of mmdet3d DynamicSimpleVFE (DynamicScatter with mean reduction)."""

    def __init__(self, voxel_size=(0.2, 0.2, 4), point_cloud_range=(0, -40, -3, 70.4, 40, 1)):
        vx, vy, vz = voxel_size
        x0, y0, z0, x1, y1, z1 = point_cloud_range
        self.Dx = int(round((x1 - x0) / vx))
        self.Dy = int(round((y1 - y0) / vy))
        self.Dz = int(round((z1 - z0) / vz))

    def __call__(self, features, coors, batch_size, *, tv=512, tn=2048):
        # features: (N, C) float32; coors: (N, 4) int32 as (batch, z, y, x)
        N, C = features.shape
        Dx, Dy, Dz = self.Dx, self.Dy, self.Dz
        V = batch_size * Dz * Dy * Dx
        # Voxel ids are compared as exact float32 integers inside the kernel.
        # TODO(synk): for V >= 2**24 keep the vid row as int32 bits (pltpu.bitcast) instead.
        assert V < (1 << 24), "float32 voxel-id compare requires V < 2**24"

        tv = max(128, (tv // 128) * 128)
        tn = max(128, (tn // 128) * 128)
        V_pad = _round_up(V, tv)
        num_vtiles = V_pad // tv
        c_sub = max(8, _round_up(C + 2, 8))   # C channels + count row + vid row, sublane-padded

        # ---- per-point linear voxel id / voxel-tile key -------------------------------------
        valid = jnp.all(coors >= 0, axis=1)
        b, z, y, x = coors[:, 0], coors[:, 1], coors[:, 2], coors[:, 3]
        vid = (((b * Dz + z) * Dy + y) * Dx + x).astype(jnp.int32)
        vid = jnp.where(valid, vid, -1)
        vt_pt = jnp.where(valid, vid // tv, num_vtiles).astype(jnp.int32)   # invalid -> sorts last

        # ---- group points by voxel tile (one sort) and TN-align every tile's segment --------
        order = jnp.argsort(vt_pt)
        vt_sorted = vt_pt[order]
        vid_sorted = vid[order]
        feat_sorted = features[order].astype(jnp.float32)                   # (N, C)

        tile_cnt = jnp.zeros((num_vtiles,), jnp.int32).at[vt_pt].add(1, mode="drop")
        tile_nptile = (tile_cnt + tn - 1) // tn                             # point tiles per voxel tile
        zero1 = jnp.zeros((1,), jnp.int32)
        ptile_off = jnp.concatenate([zero1, jnp.cumsum(tile_nptile).astype(jnp.int32)])
        tile_start = jnp.concatenate([zero1, jnp.cumsum(tile_cnt).astype(jnp.int32)])
        T_total = ptile_off[num_vtiles]                                     # dynamic #real point tiles

        T_bound = max(1, math.ceil(N / tn) + min(num_vtiles, N))            # static upper bound
        Np_buf = T_bound * tn

        # destination slot of every sorted point in the grouped + padded point buffer
        j = jnp.arange(N, dtype=jnp.int32)
        rank = j - tile_start[vt_sorted]
        dest = ptile_off[vt_sorted] * tn + rank
        dest = jnp.where(vt_sorted < num_vtiles, dest, Np_buf)              # invalid points dropped

        # grouped feature buffer (c_sub, Np_buf): rows 0..C-1 features, C = 1.0 (count),
        # C+1 = voxel id as float (-1 for padding / invalid), remaining rows zero.
        cols = jnp.concatenate(
            [feat_sorted.T,
             jnp.ones((1, N), jnp.float32),
             vid_sorted.astype(jnp.float32)[None, :],
             jnp.zeros((c_sub - C - 2, N), jnp.float32)], axis=0)
        feat_g = jnp.zeros((c_sub, Np_buf), jnp.float32).at[C + 1, :].set(-1.0)
        feat_g = feat_g.at[:, dest].set(cols, mode="drop")

        # ---- per-point-tile schedule (scalar-prefetched into SMEM) --------------------------
        p = jnp.arange(T_bound, dtype=jnp.int32)
        vt_of_p = jnp.searchsorted(ptile_off[1:], p, side="right").astype(jnp.int32)
        is_real = p < T_total
        first_arr = (is_real & (p == ptile_off[vt_of_p])).astype(jnp.int32)
        last_arr = (is_real &
                    (p == ptile_off[jnp.minimum(vt_of_p + 1, num_vtiles)] - 1)).astype(jnp.int32)
        valid_arr = is_real.astype(jnp.int32)
        last_real = jnp.maximum(T_total - 1, 0)
        vt_last = jnp.where(T_total > 0, vt_of_p[last_real], 0)
        vt_arr = jnp.where(is_real, vt_of_p, vt_last).astype(jnp.int32)     # padding -> same out block
        src_arr = jnp.where(is_real, p, last_real).astype(jnp.int32)        # padding -> DMA skipped

        # ---- Pallas kernel: per-voxel channel means, output (c_sub, V_pad) ------------------
        kernel = _make_scatter_mean_kernel(C, tv)
        out_t = pl.pallas_call(
            kernel,
            out_shape=jax.ShapeDtypeStruct((c_sub, V_pad), jnp.float32),
            grid_spec=pltpu.PrefetchScalarGridSpec(
                num_scalar_prefetch=5,
                grid=(T_bound,),
                in_specs=[pl.BlockSpec(
                    (c_sub, tn),
                    lambda k, vt, src, first, valid_, last: (0, src[k]))],
                out_specs=pl.BlockSpec(
                    (c_sub, tv),
                    lambda k, vt, src, first, valid_, last: (0, vt[k])),
            ),
            compiler_params=pltpu.CompilerParams(
                dimension_semantics=("arbitrary",),
                vmem_limit_bytes=48 * 1024 * 1024),
        )(vt_arr, src_arr, first_arr, valid_arr, last_arr, feat_g)

        means = out_t[:C, :V]                                               # (C, V), already divided

        # ---- wrapper-side per-voxel counts -> non-empty test (never reads unwritten tiles) --
        cnt_idx = jnp.where(valid, vid, V)
        voxel_cnt = jnp.zeros((V,), jnp.int32).at[cnt_idx].add(1, mode="drop")
        nonempty = voxel_cnt > 0
        num_voxels = jnp.sum(nonempty).astype(jnp.int32)

        # O(V) prefix-sum compaction preserving lexicographic (batch, z, y, x) order
        pos = jnp.cumsum(nonempty.astype(jnp.int32)) - 1
        scatter_idx = jnp.where(nonempty, pos, V)
        packed_ids = jnp.zeros((V,), jnp.int32).at[scatter_idx].set(
            jnp.arange(V, dtype=jnp.int32), mode="drop")

        voxel_feats = jnp.take(means, packed_ids, axis=1).T                 # (V, C)

        xx = packed_ids % Dx
        yy = (packed_ids // Dx) % Dy
        zz = (packed_ids // (Dx * Dy)) % Dz
        bb = packed_ids // (Dx * Dy * Dz)
        voxel_coors = jnp.stack([bb, zz, yy, xx], axis=1).astype(jnp.int32)

        # rows >= num_voxels are padding; mark their coors as -1, feats as 0
        pad_mask = (jnp.arange(V) >= num_voxels)[:, None]
        voxel_coors = jnp.where(pad_mask, -1, voxel_coors)
        voxel_feats = jnp.where(pad_mask, 0.0, voxel_feats)

        return voxel_feats, voxel_coors, num_voxels


if __name__ == "__main__":
    # Small grid: voxel_size=(1,1,4), range=(0,-24,-3,16,24,1) -> Dx=16, Dy=48, Dz=1; batch=2
    # -> V=1536 dense voxels = 3 voxel tiles of 512 (the last one stays empty -> exercises the
    # untouched-output-tile path).  tn=128 exercises multiple point tiles per voxel tile.
    voxel_size = (1.0, 1.0, 4.0)
    point_cloud_range = (0.0, -24.0, -3.0, 16.0, 24.0, 1.0)
    batch_size = 2
    N, C = 300, 4

    key = jax.random.PRNGKey(0)
    kf, kb, kz, ky, kx, kinv = jax.random.split(key, 6)
    features = jax.random.normal(kf, (N, C), dtype=jnp.float32)
    b = jax.random.randint(kb, (N,), 0, batch_size)
    z = jax.random.randint(kz, (N,), 0, 1)
    y = jax.random.randint(ky, (N,), 0, 16)
    x = jax.random.randint(kx, (N,), 0, 16)
    coors = jnp.stack([b, z, y, x], axis=1).astype(jnp.int32)
    # drop a few points (out-of-range marker -1, as dynamic voxelization produces)
    drop = jax.random.bernoulli(kinv, 0.05, (N,))
    coors = jnp.where(drop[:, None], -1, coors)

    vfe = DynamicSimpleVFE(voxel_size, point_cloud_range)
    voxel_feats, voxel_coors, num_voxels = vfe(features, coors, batch_size, tn=128)
    jax.block_until_ready((voxel_feats, voxel_coors, num_voxels))

    # ---- numpy reference (segment mean over unique voxel coords) ----
    feats_np = np.asarray(features)
    coors_np = np.asarray(coors)
    Dx, Dy, Dz = vfe.Dx, vfe.Dy, vfe.Dz
    V = batch_size * Dz * Dy * Dx
    sums = np.zeros((V, C), np.float64)
    cnts = np.zeros((V,), np.float64)
    for i in range(N):
        if (coors_np[i] < 0).any():
            continue
        bi, zi, yi, xi = coors_np[i]
        vid = ((bi * Dz + zi) * Dy + yi) * Dx + xi
        sums[vid] += feats_np[i]
        cnts[vid] += 1
    valid_ids = np.where(cnts > 0)[0]               # sorted -> lexicographic coors order
    ref_feats = sums[valid_ids] / cnts[valid_ids][:, None]
    ref_coors = np.stack([valid_ids // (Dx * Dy * Dz),
                          (valid_ids // (Dx * Dy)) % Dz,
                          (valid_ids // Dx) % Dy,
                          valid_ids % Dx], axis=1)

    M = int(num_voxels)
    assert M == len(valid_ids), (M, len(valid_ids))
    np.testing.assert_allclose(np.asarray(voxel_feats)[:M], ref_feats, rtol=1e-5, atol=1e-5)
    np.testing.assert_array_equal(np.asarray(voxel_coors)[:M], ref_coors)

    print("KERNEL_OK")
</pallas_src>

<mosaic_0001>
module attributes {stable_mosaic.version = 11 : i64} {
  func.func @kernel(%arg0: i32, %arg1: memref<6xi32, #tpu.memory_space<smem>>, %arg2: memref<6xi32, #tpu.memory_space<smem>>, %arg3: memref<6xi32, #tpu.memory_space<smem>>, %arg4: memref<6xi32, #tpu.memory_space<smem>>, %arg5: memref<6xi32, #tpu.memory_space<smem>>, %arg6: memref<8x128xf32, #tpu.memory_space<vmem>>, %arg7: memref<8x512xf32, #tpu.memory_space<vmem>>) attributes {dimension_semantics = [#tpu.dimension_semantics<arbitrary>], iteration_bounds = array<i64: 6>, scalar_prefetch = 5 : i64, scratch_operands = 0 : i64, tpu.core_type = #tpu.core_type<tc>, window_params = [{transform_indices = @transform_0, window_bounds = array<i64: 8, 128>}, {transform_indices = @transform_1, window_bounds = array<i64: 8, 512>}]} {
    %0 = arith.index_cast %arg0 : i32 to index
    %1 = memref.load %arg3[%0] : memref<6xi32, #tpu.memory_space<smem>>
    %c1_i32 = arith.constant 1 : i32
    %2 = arith.cmpi eq, %1, %c1_i32 : i32
    %3 = arith.extui %2 : i1 to i32
    %c0_i32 = arith.constant 0 : i32
    %4 = arith.cmpi ne, %3, %c0_i32 : i32
    scf.if %4 {
      %cst = arith.constant 0.000000e+00 : f32
      %15 = vector.broadcast %cst : f32 to vector<8x512xf32>
      %c0 = arith.constant 0 : index
      %c0_4 = arith.constant 0 : index
      %16 = vector.load %arg7[%c0, %c0_4] : memref<8x512xf32, #tpu.memory_space<vmem>>, vector<8x512xf32>
      tpu.vector_store %arg7[%c0, %c0_4], %15 {strides = array<i32>} : memref<8x512xf32, #tpu.memory_space<vmem>>, vector<8x512xf32>,
    } else {
    }
    %5 = arith.index_cast %arg0 : i32 to index
    %6 = memref.load %arg4[%5] : memref<6xi32, #tpu.memory_space<smem>>
    %c1_i32_0 = arith.constant 1 : i32
    %7 = arith.cmpi eq, %6, %c1_i32_0 : i32
    %8 = arith.extui %7 : i1 to i32
    %c0_i32_1 = arith.constant 0 : i32
    %9 = arith.cmpi ne, %8, %c0_i32_1 : i32
    scf.if %9 {
      %c0 = arith.constant 0 : index
      %c0_4 = arith.constant 0 : index
      %15 = vector.load %arg6[%c0, %c0_4] : memref<8x128xf32, #tpu.memory_space<vmem>>, vector<8x128xf32>
      %16 = vector.extract_strided_slice %15 {offsets = [5, 0], sizes = [1, 128], strides = [1, 1]} : vector<8x128xf32> to vector<1x128xf32>
      %17 = arith.index_cast %arg0 : i32 to index
      %18 = memref.load %arg1[%17] : memref<6xi32, #tpu.memory_space<smem>>
      %c512_i32 = arith.constant 512 : i32
      %19 = arith.muli %18, %c512_i32 : i32
      %20 = tpu.iota {dimensions = array<i32: 0>} : vector<512x1xi32>
      %21 = vector.broadcast %19 : i32 to vector<512x1xi32>
      %22 = arith.addi %21, %20 : vector<512x1xi32>
      %23 = arith.sitofp %22 : vector<512x1xi32> to vector<512x1xf32>
      %24 = vector.broadcast %16 : vector<1x128xf32> to vector<512x128xf32>
      %25 = vector.broadcast %23 : vector<512x1xf32> to vector<512x128xf32>
      %26 = arith.cmpf oeq, %24, %25 : vector<512x128xf32>
      %27 = arith.extui %26 : vector<512x128xi1> to vector<512x128xi32>
      %28 = arith.sitofp %27 : vector<512x128xi32> to vector<512x128xf32>
      %c0_5 = arith.constant 0 : index
      %c0_6 = arith.constant 0 : index
      %29 = vector.load %arg7[%c0_5, %c0_6] : memref<8x512xf32, #tpu.memory_space<vmem>>, vector<8x512xf32>
      %cst = arith.constant dense<0.000000e+00> : vector<8x512xf32>
      %30 = tpu.matmul %15, %28, %cst {dimension_numbers = #tpu.dot_dimension_numbers<[1], [1], [0], [0], [0, 0, 1, 0], [], []>} : vector<8x128xf32>, vector<512x128xf32>, vector<8x512xf32> -> vector<8x512xf32>
      %31 = arith.addf %29, %30 : vector<8x512xf32>
      %c0_7 = arith.constant 0 : index
      %c0_8 = arith.constant 0 : index
      %32 = vector.load %arg7[%c0_7, %c0_8] : memref<8x512xf32, #tpu.memory_space<vmem>>, vector<8x512xf32>
      tpu.vector_store %arg7[%c0_7, %c0_8], %31 {strides = array<i32>} : memref<8x512xf32, #tpu.memory_space<vmem>>, vector<8x512xf32>,
    } else {
    }
    %10 = arith.index_cast %arg0 : i32 to index
    %11 = memref.load %arg5[%10] : memref<6xi32, #tpu.memory_space<smem>>
    %c1_i32_2 = arith.constant 1 : i32
    %12 = arith.cmpi eq, %11, %c1_i32_2 : i32
    %13 = arith.extui %12 : i1 to i32
    %c0_i32_3 = arith.constant 0 : i32
    %14 = arith.cmpi ne, %13, %c0_i32_3 : i32
    scf.if %14 {
      %c0 = arith.constant 0 : index
      %c0_4 = arith.constant 0 : index
      %15 = vector.load %arg7[%c0, %c0_4] : memref<8x512xf32, #tpu.memory_space<vmem>>, vector<8x512xf32>
      %16 = vector.extract_strided_slice %15 {offsets = [4, 0], sizes = [1, 512], strides = [1, 1]} : vector<8x512xf32> to vector<1x512xf32>
      %cst = arith.constant 1.000000e+00 : f32
      %17 = vector.broadcast %cst : f32 to vector<1x512xf32>
      %18 = arith.maximumf %16, %17 : vector<1x512xf32>
      %cst_5 = arith.constant 1.000000e+00 : f32
      %19 = vector.broadcast %cst_5 : f32 to vector<1x512xf32>
      %20 = arith.divf %19, %18 : vector<1x512xf32>
      %21 = vector.broadcast %20 : vector<1x512xf32> to vector<8x512xf32>
      %22 = arith.mulf %15, %21 : vector<8x512xf32>
      %c0_6 = arith.constant 0 : index
      %c0_7 = arith.constant 0 : index
      %23 = vector.load %arg7[%c0_6, %c0_7] : memref<8x512xf32, #tpu.memory_space<vmem>>, vector<8x512xf32>
      tpu.vector_store %arg7[%c0_6, %c0_7], %22 {strides = array<i32>} : memref<8x512xf32, #tpu.memory_space<vmem>>, vector<8x512xf32>,
    } else {
    }
    return
  }
  func.func @transform_0(%arg0: i32, %arg1: memref<6xi32, #tpu.memory_space<smem>>, %arg2: memref<6xi32, #tpu.memory_space<smem>>, %arg3: memref<6xi32, #tpu.memory_space<smem>>, %arg4: memref<6xi32, #tpu.memory_space<smem>>, %arg5: memref<6xi32, #tpu.memory_space<smem>>) -> (i32, i32) {
    %0 = arith.index_cast %arg0 : i32 to index
    %1 = memref.load %arg2[%0] : memref<6xi32, #tpu.memory_space<smem>>
    %c0_i32 = arith.constant 0 : i32
    %c0_i32_0 = arith.constant 0 : i32
    return %c0_i32, %1 : i32, i32
  }
  func.func @transform_1(%arg0: i32, %arg1: memref<6xi32, #tpu.memory_space<smem>>, %arg2: memref<6xi32, #tpu.memory_space<smem>>, %arg3: memref<6xi32, #tpu.memory_space<smem>>, %arg4: memref<6xi32, #tpu.memory_space<smem>>, %arg5: memref<6xi32, #tpu.memory_space<smem>>) -> (i32, i32) {
    %0 = arith.index_cast %arg0 : i32 to index
    %1 = memref.load %arg1[%0] : memref<6xi32, #tpu.memory_space<smem>>
    %c0_i32 = arith.constant 0 : i32
    %c0_i32_0 = arith.constant 0 : i32
    return %c0_i32, %1 : i32, i32
  }
}

</mosaic_0001>

<bundles_post_ra>
// kernel: tpu_custom_call.1
= control target key start
LH: loop header
LB: loop body
LE: loop exit
PB: predicated region body
PF: predicated region fallthrough
CT: control target
= control target key end

     0   :  { %s1338_s21 = smov [#allocation3]   ;;  %s1988_s0 = inlined_call_operand.hbm [shape: s32[6], index: 0, kind: input, shape index: {}]   ;;  %s1989_s5 = inlined_call_operand.hbm [shape: f32[8,768], index: 5, kind: input, shape index: {}]   ;;  %s1990_s6 = inlined_call_operand.hbm [shape: f32[8,1536], index: 6, kind: output, shape index: {}]   ;;  %s1991_s1 = inlined_call_operand.vmem [shape: s32[6], index: 1, kind: input, shape index: {}]   ;;  %s1992_s2 = inlined_call_operand.vmem [shape: s32[6], index: 2, kind: input, shape index: {}]   ;;  %s1993_s3 = inlined_call_operand.vmem [shape: s32[6], index: 3, kind: input, shape index: {}]   ;;  %s1994_s4 = inlined_call_operand.vmem [shape: s32[6], index: 4, kind: input, shape index: {}]  }
   0x1   :  { %12 = dma.hbm_to_smem %s1988_s0, 16, %s1338_s21, [#allocation2] }
   0x2   :  { %s13_s26 = sshll.u32 %s1991_s1, 4  ;;  %s17_s29 = sshll.u32 %s1992_s2, 4  ;;  %s14_s26 = int_to_ptr.vmem [resolvable:$true] %s13_s26  ;;  %s18_s29 = int_to_ptr.vmem [resolvable:$true] %s17_s29 }
   0x3   :  { %s1170_s30 = scalar_lea.vmem %s14_s26, 16  ;;  %p1175_p1 = scmp.lt.s32.totalorder %s14_s26, %s14_s26 }
   0x4   :  { %p1171_p0 = scmp.ne.s32.totalorder %s14_s26, %s1170_s30  ;;  %p1176_p2 = scmp.lt.s32.totalorder %s1170_s30, %s1170_s30 }
   0x6   :  { %p1177_p3 = por %p1176_p2, %p1175_p1 }
   0x8   :  { %p1178_p4 = pnand %p1177_p3, %p1171_p0 }
   0xa   :  { %1181 = shalt.err (!%p1178_p4)  }
   0xb   :  { %s1339_s7 = smov [#allocation4]   ;;  %s21_s9 = sshll.u32 %s1993_s3, 4  ;;  %s22_s9 = int_to_ptr.vmem [resolvable:$true] %s21_s9 }
   0xc   :  { %16 = dma.vmem_to_smem %s14_s26, 16, %s1339_s7, [#allocation2] }
   0xd   :  { %s1182_s1 = scalar_lea.vmem %s18_s29, 16  ;;  %p1187_p6 = scmp.lt.s32.totalorder %s18_s29, %s18_s29 }
   0xe   :  { %p1183_p5 = scmp.ne.s32.totalorder %s18_s29, %s1182_s1  ;;  %p1188_p7 = scmp.lt.s32.totalorder %s1182_s1, %s1182_s1 }
  0x10   :  { %p1189_p8 = por %p1188_p7, %p1187_p6 }
  0x12   :  { %p1190_p9 = pnand %p1189_p8, %p1183_p5 }
  0x14   :  { %1193 = shalt.err (!%p1190_p9)  }
  0x15   :  { %s1340_s2 = smov [#allocation5]   ;;  %s1194_s10 = scalar_lea.vmem %s22_s9, 16 }
  0x16   :  { %20 = dma.vmem_to_smem %s18_s29, 16, %s1340_s2, [#allocation2] }
  0x17   :  { %p1195_p10 = scmp.ne.s32.totalorder %s22_s9, %s1194_s10  ;;  %p1199_p11 = scmp.lt.s32.totalorder %s22_s9, %s22_s9 }
  0x18   :  { %p1200_p12 = scmp.lt.s32.totalorder %s1194_s10, %s1194_s10 }
  0x1a   :  { %p1201_p13 = por %p1200_p12, %p1199_p11 }
  0x1c   :  { %p1202_p0 = pnand %p1201_p13, %p1195_p10 }
  0x1e   :  { %1205 = shalt.err (!%p1202_p0)  }
  0x1f   :  { %s1341_s11 = smov [#allocation6]   ;;  %s25_s13 = sshll.u32 %s1994_s4, 4  ;;  %s26_s13 = int_to_ptr.vmem [resolvable:$true] %s25_s13 }
  0x20   :  { %24 = dma.vmem_to_smem %s22_s9, 16, %s1341_s11, [#allocation2] }
  0x21   :  { %s1206_s14 = scalar_lea.vmem %s26_s13, 16  ;;  %p1211_p2 = scmp.lt.s32.totalorder %s26_s13, %s26_s13 }
  0x22   :  { %p1207_p1 = scmp.ne.s32.totalorder %s26_s13, %s1206_s14  ;;  %p1212_p3 = scmp.lt.s32.totalorder %s1206_s14, %s1206_s14 }
  0x24   :  { %p1213_p4 = por %p1212_p3, %p1211_p2 }
  0x26   :  { %p1214_p5 = pnand %p1213_p4, %p1207_p1 }
  0x28   :  { %1217 = shalt.err (!%p1214_p5)  }
  0x29   :  { %s1342_s15 = smov [#allocation7]  }
  0x2a   :  { %28 = dma.vmem_to_smem %s26_s13, 16, %s1342_s15, [#allocation2] }
  0x2b   :  { %1300 = dma.done.wait [#allocation2], 80 }
  0x2c   :  { %1301 = vsyncadd [#allocation2], 4294967216 }
  0x2d   :  { %30 = sfence }
  0x2e   :  { %31 = vsyncpa [#allocation9], 0 }
  0x2f   :  { %33 = vsyncpa [#allocation9 + $0x1], 0 }
  0x30   :  { %34 = vsyncpa [#allocation10], 0 }
  0x31   :  { %36 = vsyncpa [#allocation10 + $0x1], 0  ;;  %s1397_s16 = smov 0   ;;  %s1399_s4 = smov 0  }
  0x32   :  { %s1401_s17 = smov 0   ;;  %s1403_s18 = smov 0  }
  0x33   :  { %s1405_s19 = smov 0   ;;  %s1407_s20 = smov 0  }
  0x34   :  { %s1409_s21 = smov 0  }
  0x35 LB: > { %s1431_s22 = sadd.s32 4294967295, %s1336_s21   ;;  %s857_s23 = sadd.s32 4294967294, %s1336_s21   ;;  %s1336_s21 = sphi %s1409_s21, %s2053_s21   ;;  %s1332_s20 = sphi %s1407_s20, %s2052_s20   ;;  %s1328_s19 = sphi %s1405_s19, %s2051_s19   ;;  %s1324_s18 = sphi %s1403_s18, %s2050_s18   ;;  %s1320_s17 = sphi %s1401_s17, %s2049_s17   ;;  %s1316_s4 = sphi %s1399_s4, %s2048_s4   ;;  %s1312_s16 = sphi %s1397_s16, %s2047_s16  }
  0x36   : > { %s1435_s24 = sadd.s32 1, %s1336_s21   ;;  %s46_s25 = sld [smem:[#allocation4 + %s1336_s21]] }
  0x37   : > { %s47_s26 = sld [smem:[#allocation4 + %s1435_s24]]  ;;  %s51_s27 = sadd.s32 1, %s1332_s20 }
  0x38   : > { %p58_p6 = scmp.ne.s32.totalorder %s1332_s20, %s1328_s19  ;;  %p59_p7 = scmp.eq.s32.totalorder %s1336_s21, 0 }
  0x39   : > { %p64_p8 = scmp.ne.s32.totalorder %s1328_s19, %s1324_s18  ;;  %p65_p9 = scmp.eq.s32.totalorder %s1431_s22, 0 }
  0x3a   : > { %p1445_p10 = por %p59_p7, %p58_p6  ;;  %s74_s29 = sld [smem:[#allocation3 + %s1336_s21]] }
  0x3b   : > { %p1450_p11 = por %p65_p9, %p64_p8  ;;  %s75_s7 = sld [smem:[#allocation3 + %s1435_s24]] }
  0x3c   : > { %s79_s0 = sadd.s32 1, %s1320_s17  ;;  %p89_p12 = scmp.ne.s32.totalorder %s1320_s17, %s1316_s4 }
  0x3d   : > { %s1998_s30 = scalar_select %p1450_p11, 1, 0 }
  0x3e   : > { %s48_s8 = ssub.s32 %s46_s25, %s47_s26  ;;  %p90_p13 = scmp.eq.s32.totalorder %s1431_s22, 5 }
  0x3f   : > { %p49_p0 = scmp.eq.s32.totalorder %s48_s8, 0  ;;  %p95_p1 = scmp.ne.s32.totalorder %s1316_s4, %s1312_s16 }
  0x40   : > { %p1461_p2 = por %p90_p13, %p89_p12  ;;  %p96_p3 = scmp.eq.s32.totalorder %s857_s23, 5 }
  0x41   : > { %s1466_s1 = scalar_select %p49_p0, %s1332_s20, %s51_s27  }
  0x42   : > { %s1999_s9 = scalar_select %p1461_p2, 1, 0 }
  0x43   : > { %s76_s2 = ssub.s32 %s74_s29, %s75_s7  ;;  %p1468_p4 = por %p96_p3, %p95_p1 }
  0x44   : > { %p77_p5 = scmp.eq.s32.totalorder %s76_s2, 0  ;;  %p1089_p6 = scmp.lt.s32.totalorder %s1336_s21, 6 }
  0x45   : > { %s2000_s10 = scalar_select %p1468_p4, 1, 0 }
  0x46   : > { %s116_s11 = sand.u32 1, %s1332_s20   ;;  %p1479_p7 = pnand %p1089_p6, %p1445_p10 }
  0x47   : > { %s1475_s3 = scalar_select %p77_p5, %s1320_s17, %s79_s0  }
  0x48   : > { %s860_s12 = sshll.u32 %s116_s11, 3  ;;  %p862_p8 = scmp.ge.s32.totalorder %s1336_s21, 1 }
  0x49   : > { %s1071_s14 = scalar_select %p1445_p10, [#allocation4], [#allocation12] }
  0x4a   : > { %s1072_s15 = scalar_select %p1445_p10, %s1336_s21, 0 }
  0x4b   : > { %s2055_s14 = smov (!%p1089_p6, %s1071_s14), [#allocation14]  ;;  %p133_p9 = scmp.lt.s32.totalorder %s1336_s21, 7 }
  0x4c   : > { %s2057_s15 = smov (!%p1089_p6, %s1072_s15), 0  ;;  %s120_s23 = scalar_lea.vmem [#allocation8], %s860_s12 }
  0x4d   : > { %s121_s18 = sld [smem:[%s2055_s14 + %s2057_s15]]  ;;  %s128_s25 = sshll.u32 %s120_s23, 4  ;;  %s1494_s25 = int_to_ptr.vmem [resolvable:$true] %s128_s25 }
  0x4e   : > { %p1490_p12 = pnand %p862_p8, %p133_p9  ;;  %s117_s0 = scalar_lea.sflag [#allocation9], %s116_s11 }
  0x4f   : > { %p1220_p13 = pneg %p1479_p7  ;;  %s1223_s14 = scalar_lea.hbm %s1989_s5, 768 }
  0x50   : > { %s2002_s26 = scalar_select %p1490_p12, 1, 0 }
  0x53   : > { %s861_s27 = sshll.u32 %s121_s18, 7 }
  0x54   : > { %s126_s28 = scalar_lea.hbm %s1989_s5, %s861_s27 }
  0x55   : > { %s1218_s8 = scalar_lea.hbm %s126_s28, 128  ;;  %p1224_p3 = scmp.lt.s32.totalorder %s126_s28, %s1989_s5 }
  0x56   : > { %p1219_p10 = scmp.ne.s32.totalorder %s126_s28, %s1218_s8  ;;  %p1225_p5 = scmp.lt.s32.totalorder %s1223_s14, %s1218_s8 }
  0x58   : > { %p1221_p0 = pnand %p1220_p13, %p1219_p10  ;;  %p1226_p6 = por %p1225_p5, %p1224_p3 }
  0x5a   : > { %p1222_p1 = pneg %p1221_p0 }
  0x5c   : > { %p1227_p8 = pnand %p1226_p6, %p1222_p1 }
  0x5e   : > { %1230 = shalt.err (!%p1227_p8)
}
  0x5f   : > { %s1231_s11 = scalar_lea.vmem %s1494_s25, 128  ;;  %s1343_s18 = smov [#allocation8]  }
  0x60   : > { %p1232_p9 = scmp.ne.s32.totalorder %s1494_s25, %s1231_s11  ;;  %s1236_s27 = sshll.u32 %s1343_s18, 4  ;;  %s1237_s27 = int_to_ptr.vmem [resolvable:$false] %s1236_s27 }
  0x61   : > { %s1238_s29 = scalar_lea.vmem %s1237_s27, 256  ;;  %p1239_p0 = scmp.lt.s32.totalorder %s1494_s25, %s1237_s27 }
  0x62   : > { %p1234_p4 = pnand %p1232_p9, %p1220_p13  ;;  %p1240_p2 = scmp.lt.s32.totalorder %s1238_s29, %s1231_s11 }
  0x64   : > { %p1235_p10 = pneg %p1234_p4  ;;  %p1241_p11 = por %p1240_p2, %p1239_p0 }
  0x66   : > { %p1242_p12 = pnand %p1241_p11, %p1235_p10 }
  0x68   : > { %1245 = shalt.err (!%p1242_p12)
}
  0x69   : > { %1084 = dma.hbm_to_vmem [thread:$0]  (!%p1479_p7), %s126_s28, 128, %s1494_s25, %s117_s0  }
  0x6a   : > { %p2003_p1 = scmp.ne.s32.totalorder %s2002_s26, 0 }
  0x6b   : > { %s139_s7 = sand.u32 (!%p2003_p1), 1, %s1328_s19   ;;  %p2004_p4 = scmp.ne.s32.totalorder (!%p2003_p1), %s1998_s30, 0 }
  0x6c   : > { %137 = sbr.rel (%p2003_p1) target bundleno = 481 (0x1e1), region = 24  ;;  %s863_s8 = sshll.u32 (!%p2003_p1), %s139_s7, 3 }
  0x6d   : > { %s140_s2 = scalar_lea.sflag (!%p2003_p1), [#allocation9], %s139_s7  ;;  %s143_s12 = scalar_lea.vmem (!%p2003_p1), [#allocation8], %s863_s8 }
  0x71   : > { %1303 = dma.done.wait (%p2004_p4), %s140_s2, 128  }
  0x72   : > { %1305 = vsyncadd (%p2004_p4), %s140_s2, 4294967168  ;;  %s159_s13 = sand.u32 1, %s1316_s4   ;;  %s165_s14 = sld [smem:[#allocation5 + %s1431_s22]] }
  0x73   : > { %s864_s25 = sshll.u32 %s159_s13, 5 }
  0x74   : > { %s1524_s26 = scalar_lea.vmem [#allocation11], %s864_s25 }
  0x78   : > { %p865_p11 = scmp.ne.s32.totalorder %s165_s14, 1 }
  0x7a   : > { %169 = sbr.rel (%p865_p11) target bundleno = 130 (0x82), region = 32 }
  0x7f   : > { %v1344_v0 = vmov 0.0  }
  0x80   : > { %170 = vst [vmem:[%s1524_s26] sm:$0xff] %v1344_v0  ;;  %171 = vst [vmem:[%s1524_s26 + $0x8] sm:$0xff] %v1344_v0 }
  0x81   : > { %172 = vst [vmem:[%s1524_s26 + $0x10] sm:$0xff] %v1344_v0  ;;  %173 = vst [vmem:[%s1524_s26 + $0x18] sm:$0xff] %v1344_v0 }
  0x82 PF: > { %s174_s30 = sld [smem:[#allocation6 + %s1431_s22]] }
  0x88   : > { %p866_p2 = scmp.ne.s32.totalorder %s174_s30, 1 }
  0x89   : > { %s180_s28 = sld [smem:[#allocation3 + %s1431_s22]] (!%p866_p2) }
  0x8a   : > { %178 = sbr.rel (%p866_p2) target bundleno = 418 (0x1a2), region = 36 }
  0x8f   : > { %v1531_v1 = vld [vmem:[%s143_s12] sm:$0xff]  ;;  %v182_v2 = vlaneseq  ;;  %s867_s0 = sshll.u32 %s180_s28, 9  ;;  %v1345_v36 = vmov 1.0  }
  0x90   : > { %1035 = vmatprep.mubr.f32.mxu0 %v1531_v1  ;;  %1069 = vmatprep.mubr.f32.mxu1 %v1531_v1  ;;  %v1552_v16 = vstv %s867_s0 }
  0x91   : > { %v1536_v3 = vshrl.u32 %v182_v2, 7 }
  0x93   : > { %v214_v4 = vadd.s32 248, %v1536_v3  ;;  %v378_v5 = vsub.s32 5, %v1536_v3  ;;  %v246_v6 = vadd.s32 504, %v1536_v3  ;;  %v198_v7 = vadd.s32 120, %v1536_v3 }
  0x94   : > { %v230_v8 = vadd.s32 376, %v1536_v3  ;;  %v213_v9 = vadd.s32 240, %v1536_v3  ;;  %v245_v10 = vadd.s32 496, %v1536_v3  ;;  %v197_v11 = vadd.s32 112, %v1536_v3 }
  0x95   : > { %v1547_v12 = vrot.slane %v1531_v1, %v378_v5  ;;  %v229_v13 = vadd.s32 368, %v1536_v3  ;;  %v212_v14 = vadd.s32 232, %v1536_v3  ;;  %v244_v15 = vadd.s32 488, %v1536_v3 }
  0x96   : > { %v196_v17 = vadd.s32 104, %v1536_v3  ;;  %v228_v18 = vadd.s32 360, %v1536_v3  ;;  %v211_v19 = vadd.s32 224, %v1536_v3  ;;  %v279_v20 = vadd.s32 %v1552_v16, %v214_v4 }
  0x97   : > { %v311_v21 = vadd.s32 %v1552_v16, %v246_v6  ;;  %v263_v22 = vadd.s32 %v1552_v16, %v198_v7  ;;  %v295_v23 = vadd.s32 %v1552_v16, %v230_v8  ;;  %v278_v24 = vadd.s32 %v1552_v16, %v213_v9 }
  0x98   : > { %v310_v25 = vadd.s32 %v1552_v16, %v245_v10  ;;  %v262_v26 = vadd.s32 %v1552_v16, %v197_v11  ;;  %v294_v27 = vadd.s32 %v1552_v16, %v229_v13  ;;  %v343_v28 = vcvt.s32.f32 %v279_v20 }
  0x99   : > { %v375_v29 = vcvt.s32.f32 %v311_v21  ;;  %v327_v30 = vcvt.s32.f32 %v263_v22  ;;  %v359_v31 = vcvt.s32.f32 %v295_v23  ;;  %v342_v32 = vcvt.s32.f32 %v278_v24 }
  0x9a   : > { %v374_v33 = vcvt.s32.f32 %v310_v25  ;;  %v326_v34 = vcvt.s32.f32 %v262_v26  ;;  %v358_v35 = vcvt.s32.f32 %v294_v27  ;;  %vm411_vm0 = vcmp.eq.f32.partialorder %v1547_v12, %v343_v28 }
  0x9b   : > { %vm443_vm1 = vcmp.eq.f32.partialorder %v1547_v12, %v375_v29  ;;  %vm395_vm2 = vcmp.eq.f32.partialorder %v1547_v12, %v327_v30  ;;  %vm427_vm3 = vcmp.eq.f32.partialorder %v1547_v12, %v359_v31  ;;  %1003 = vmatprep.subr.msk.mxu0 %vm411_vm0, %v1345_v36  ;;  %vm410_vm4 = vcmp.eq.f32.partialorder %v1547_v12, %v342_v32 }
  0x9c   : > { %1037 = vmatprep.subr.msk.mxu1 %vm443_vm1, %v1345_v36  ;;  %vm442_vm5 = vcmp.eq.f32.partialorder %v1547_v12, %v374_v33  ;;  %vm1574_vm6 = vcmp.eq.f32.partialorder %v1547_v12, %v326_v34  ;;  %v243_v38 = vadd.s32 480, %v1536_v3  ;;  %1004 = vmatpush3.xpose.msk.msra.mxu0 %vm395_vm2, %v1345_v36  ;;  %vm1582_vm7 = vcmp.eq.f32.partialorder %v1547_v12, %v358_v35 }
  0x9d   : > { %1038 = vmatpush3.xpose.msk.msra.mxu1 %vm427_vm3, %v1345_v36  ;;  %v277_v40 = vadd.s32 %v1552_v16, %v212_v14  ;;  %v309_v41 = vadd.s32 %v1552_v16, %v244_v15  ;;  %v195_v42 = vadd.s32 96, %v1536_v3  ;;  %1005 = vmatprep.subr.msk.mxu0 %vm410_vm4, %v1345_v36  ;;  %v261_v43 = vadd.s32 %v1552_v16, %v196_v17 }
  0x9e   : > { %1039 = vmatprep.subr.msk.mxu1 %vm442_vm5, %v1345_v36  ;;  %v293_v44 = vadd.s32 %v1552_v16, %v228_v18  ;;  %v276_v45 = vadd.s32 %v1552_v16, %v211_v19  ;;  %v227_v46 = vadd.s32 352, %v1536_v3  ;;  %v308_v49 = vadd.s32 %v1552_v16, %v243_v38 }
  0x9f   : > { %v341_v47 = vcvt.s32.f32 %v277_v40  ;;  %v373_v48 = vcvt.s32.f32 %v309_v41  ;;  %v260_v50 = vadd.s32 %v1552_v16, %v195_v42  ;;  %v325_v51 = vcvt.s32.f32 %v261_v43 }
  0xa0   : > { %v357_v52 = vcvt.s32.f32 %v293_v44  ;;  %v340_v53 = vcvt.s32.f32 %v276_v45  ;;  %v292_v54 = vadd.s32 %v1552_v16, %v227_v46  ;;  %1006 = vmatpush3.xpose.msk.msra.mxu0 %vm1574_vm6, %v1345_v36  ;;  %v372_v55 = vcvt.s32.f32 %v308_v49 }
  0xa1   : > { %1040 = vmatpush3.xpose.msk.msra.mxu1 %vm1582_vm7, %v1345_v36  ;;  %vm409_vm8 = vcmp.eq.f32.partialorder %v1547_v12, %v341_v47  ;;  %vm441_vm9 = vcmp.eq.f32.partialorder %v1547_v12, %v373_v48  ;;  %v324_v56 = vcvt.s32.f32 %v260_v50  ;;  %vm393_vm10 = vcmp.eq.f32.partialorder %v1547_v12, %v325_v51 }
  0xa2   : > { %1007 = vmatprep.subr.msk.mxu0 %vm409_vm8, %v1345_v36  ;;  %1041 = vmatprep.subr.msk.mxu1 %vm441_vm9, %v1345_v36  ;;  %vm425_vm11 = vcmp.eq.f32.partialorder %v1547_v12, %v357_v52  ;;  %vm1611_vm12 = vcmp.eq.f32.partialorder %v1547_v12, %v340_v53  ;;  %v356_v58 = vcvt.s32.f32 %v292_v54  ;;  %vm440_vm13 = vcmp.eq.f32.partialorder %v1547_v12, %v372_v55 }
  0xa3   : > { %vm1617_vm14 = vcmp.eq.f32.partialorder %v1547_v12, %v324_v56  ;;  %v210_v60 = vadd.s32 216, %v1536_v3  ;;  %v242_v61 = vadd.s32 472, %v1536_v3  ;;  %v194_v63 = vadd.s32 88, %v1536_v3 }
  0xa4   : > { %vm1624_vm15 = vcmp.eq.f32.partialorder %v1547_v12, %v356_v58  ;;  %v226_v0 = vadd.s32 344, %v1536_v3  ;;  %v209_v2 = vadd.s32 208, %v1536_v3  ;;  %1008 = vmatpush3.xpose.msk.msra.mxu0 %vm393_vm10, %v1345_v36  ;;  %v241_v6 = vadd.s32 464, %v1536_v3 }
  0xa5   : > { %1042 = vmatpush3.xpose.msk.msra.mxu1 %vm425_vm11, %v1345_v36  ;;  %v275_v4 = vadd.s32 %v1552_v16, %v210_v60  ;;  %v307_v5 = vadd.s32 %v1552_v16, %v242_v61  ;;  %v193_v7 = vadd.s32 80, %v1536_v3  ;;  %1009 = vmatprep.subr.msk.mxu0 %vm1611_vm12, %v1345_v36  ;;  %v259_v8 = vadd.s32 %v1552_v16, %v194_v63 }
  0xa6   : > { %1043 = vmatprep.subr.msk.mxu1 %vm440_vm13, %v1345_v36  ;;  %v291_v9 = vadd.s32 %v1552_v16, %v226_v0  ;;  %v274_v10 = vadd.s32 %v1552_v16, %v209_v2  ;;  %v225_v11 = vadd.s32 336, %v1536_v3  ;;  %v306_v15 = vadd.s32 %v1552_v16, %v241_v6 }
  0xa7   : > { %v339_v13 = vcvt.s32.f32 %v275_v4  ;;  %v371_v14 = vcvt.s32.f32 %v307_v5  ;;  %v258_v17 = vadd.s32 %v1552_v16, %v193_v7  ;;  %v323_v18 = vcvt.s32.f32 %v259_v8 }
  0xa8   : > { %v355_v19 = vcvt.s32.f32 %v291_v9  ;;  %v338_v20 = vcvt.s32.f32 %v274_v10  ;;  %v290_v21 = vadd.s32 %v1552_v16, %v225_v11  ;;  %1010 = vmatpush3.xpose.msk.msra.mxu0 %vm1617_vm14, %v1345_v36  ;;  %v370_v22 = vcvt.s32.f32 %v306_v15 }
  0xa9   : > { %1044 = vmatpush3.xpose.msk.msra.mxu1 %vm1624_vm15, %v1345_v36  ;;  %vm407_vm0 = vcmp.eq.f32.partialorder %v1547_v12, %v339_v13  ;;  %vm439_vm1 = vcmp.eq.f32.partialorder %v1547_v12, %v371_v14  ;;  %v322_v23 = vcvt.s32.f32 %v258_v17  ;;  %vm391_vm2 = vcmp.eq.f32.partialorder %v1547_v12, %v323_v18 }
  0xaa   : > { %1011 = vmatprep.subr.msk.mxu0 %vm407_vm0, %v1345_v36  ;;  %1045 = vmatprep.subr.msk.mxu1 %vm439_vm1, %v1345_v36  ;;  %vm423_vm3 = vcmp.eq.f32.partialorder %v1547_v12, %v355_v19  ;;  %vm1661_vm4 = vcmp.eq.f32.partialorder %v1547_v12, %v338_v20  ;;  %v354_v25 = vcvt.s32.f32 %v290_v21  ;;  %vm438_vm5 = vcmp.eq.f32.partialorder %v1547_v12, %v370_v22 }
  0xab   : > { %vm1667_vm6 = vcmp.eq.f32.partialorder %v1547_v12, %v322_v23  ;;  %v208_v27 = vadd.s32 200, %v1536_v3  ;;  %v240_v28 = vadd.s32 456, %v1536_v3  ;;  %v192_v30 = vadd.s32 72, %v1536_v3 }
  0xac   : > { %vm1674_vm7 = vcmp.eq.f32.partialorder %v1547_v12, %v354_v25  ;;  %v224_v31 = vadd.s32 328, %v1536_v3  ;;  %v207_v32 = vadd.s32 192, %v1536_v3  ;;  %1012 = vmatpush3.xpose.msk.msra.mxu0 %vm391_vm2, %v1345_v36  ;;  %v239_v35 = vadd.s32 448, %v1536_v3 }
  0xad   : > { %1046 = vmatpush3.xpose.msk.msra.mxu1 %vm423_vm3, %v1345_v36  ;;  %v273_v33 = vadd.s32 %v1552_v16, %v208_v27  ;;  %v305_v34 = vadd.s32 %v1552_v16, %v240_v28  ;;  %v191_v37 = vadd.s32 64, %v1536_v3  ;;  %1013 = vmatprep.subr.msk.mxu0 %vm1661_vm4, %v1345_v36  ;;  %v257_v38 = vadd.s32 %v1552_v16, %v192_v30 }
  0xae   : > { %1047 = vmatprep.subr.msk.mxu1 %vm438_vm5, %v1345_v36  ;;  %v289_v39 = vadd.s32 %v1552_v16, %v224_v31  ;;  %v272_v40 = vadd.s32 %v1552_v16, %v207_v32  ;;  %v223_v41 = vadd.s32 320, %v1536_v3  ;;  %v304_v44 = vadd.s32 %v1552_v16, %v239_v35 }
  0xaf   : > { %v337_v42 = vcvt.s32.f32 %v273_v33  ;;  %v369_v43 = vcvt.s32.f32 %v305_v34  ;;  %v256_v45 = vadd.s32 %v1552_v16, %v191_v37  ;;  %v321_v46 = vcvt.s32.f32 %v257_v38 }
  0xb0   : > { %v353_v47 = vcvt.s32.f32 %v289_v39  ;;  %v336_v48 = vcvt.s32.f32 %v272_v40  ;;  %v288_v49 = vadd.s32 %v1552_v16, %v223_v41  ;;  %1014 = vmatpush3.xpose.msk.msra.mxu0 %vm1667_vm6, %v1345_v36  ;;  %v368_v50 = vcvt.s32.f32 %v304_v44 }
  0xb1   : > { %1048 = vmatpush3.xpose.msk.msra.mxu1 %vm1674_vm7, %v1345_v36  ;;  %vm405_vm8 = vcmp.eq.f32.partialorder %v1547_v12, %v337_v42  ;;  %vm437_vm9 = vcmp.eq.f32.partialorder %v1547_v12, %v369_v43  ;;  %v320_v51 = vcvt.s32.f32 %v256_v45  ;;  %vm389_vm10 = vcmp.eq.f32.partialorder %v1547_v12, %v321_v46 }
  0xb2   : > { %1015 = vmatprep.subr.msk.mxu0 %vm405_vm8, %v1345_v36  ;;  %1049 = vmatprep.subr.msk.mxu1 %vm437_vm9, %v1345_v36  ;;  %vm421_vm11 = vcmp.eq.f32.partialorder %v1547_v12, %v353_v47  ;;  %vm1711_vm12 = vcmp.eq.f32.partialorder %v1547_v12, %v336_v48  ;;  %v352_v53 = vcvt.s32.f32 %v288_v49  ;;  %vm436_vm13 = vcmp.eq.f32.partialorder %v1547_v12, %v368_v50 }
  0xb3   : > { %vm1717_vm14 = vcmp.eq.f32.partialorder %v1547_v12, %v320_v51  ;;  %v206_v55 = vadd.s32 184, %v1536_v3  ;;  %v238_v56 = vadd.s32 440, %v1536_v3  ;;  %v190_v58 = vadd.s32 56, %v1536_v3 }
  0xb4   : > { %vm1724_vm15 = vcmp.eq.f32.partialorder %v1547_v12, %v352_v53  ;;  %v222_v59 = vadd.s32 312, %v1536_v3  ;;  %v205_v60 = vadd.s32 176, %v1536_v3  ;;  %1016 = vmatpush3.xpose.msk.msra.mxu0 %vm389_vm10, %v1345_v36  ;;  %v237_v63 = vadd.s32 432, %v1536_v3 }
  0xb5   : > { %1050 = vmatpush3.xpose.msk.msra.mxu1 %vm421_vm11, %v1345_v36  ;;  %v271_v61 = vadd.s32 %v1552_v16, %v206_v55  ;;  %v303_v62 = vadd.s32 %v1552_v16, %v238_v56  ;;  %v189_v0 = vadd.s32 48, %v1536_v3  ;;  %1017 = vmatprep.subr.msk.mxu0 %vm1711_vm12, %v1345_v36  ;;  %v255_v2 = vadd.s32 %v1552_v16, %v190_v58 }
  0xb6   : > { %1051 = vmatprep.subr.msk.mxu1 %vm436_vm13, %v1345_v36  ;;  %v287_v4 = vadd.s32 %v1552_v16, %v222_v59  ;;  %v270_v5 = vadd.s32 %v1552_v16, %v205_v60  ;;  %v221_v6 = vadd.s32 304, %v1536_v3  ;;  %v302_v9 = vadd.s32 %v1552_v16, %v237_v63 }
  0xb7   : > { %v335_v7 = vcvt.s32.f32 %v271_v61  ;;  %v367_v8 = vcvt.s32.f32 %v303_v62  ;;  %v254_v10 = vadd.s32 %v1552_v16, %v189_v0  ;;  %v319_v11 = vcvt.s32.f32 %v255_v2 }
  0xb8   : > { %v351_v13 = vcvt.s32.f32 %v287_v4  ;;  %v334_v14 = vcvt.s32.f32 %v270_v5  ;;  %v286_v15 = vadd.s32 %v1552_v16, %v221_v6  ;;  %1018 = vmatpush3.xpose.msk.msra.mxu0 %vm1717_vm14, %v1345_v36  ;;  %v366_v17 = vcvt.s32.f32 %v302_v9 }
  0xb9   : > { %1052 = vmatpush3.xpose.msk.msra.mxu1 %vm1724_vm15, %v1345_v36  ;;  %vm403_vm0 = vcmp.eq.f32.partialorder %v1547_v12, %v335_v7  ;;  %vm435_vm1 = vcmp.eq.f32.partialorder %v1547_v12, %v367_v8  ;;  %v318_v18 = vcvt.s32.f32 %v254_v10  ;;  %vm387_vm2 = vcmp.eq.f32.partialorder %v1547_v12, %v319_v11 }
  0xba   : > { %1019 = vmatprep.subr.msk.mxu0 %vm403_vm0, %v1345_v36  ;;  %1053 = vmatprep.subr.msk.mxu1 %vm435_vm1, %v1345_v36  ;;  %vm419_vm3 = vcmp.eq.f32.partialorder %v1547_v12, %v351_v13  ;;  %vm1761_vm4 = vcmp.eq.f32.partialorder %v1547_v12, %v334_v14  ;;  %v350_v20 = vcvt.s32.f32 %v286_v15  ;;  %vm434_vm5 = vcmp.eq.f32.partialorder %v1547_v12, %v366_v17 }
  0xbb   : > { %vm1767_vm6 = vcmp.eq.f32.partialorder %v1547_v12, %v318_v18  ;;  %v204_v22 = vadd.s32 168, %v1536_v3  ;;  %v236_v23 = vadd.s32 424, %v1536_v3  ;;  %v188_v25 = vadd.s32 40, %v1536_v3 }
  0xbc   : > { %vm1774_vm7 = vcmp.eq.f32.partialorder %v1547_v12, %v350_v20  ;;  %v220_v26 = vadd.s32 296, %v1536_v3  ;;  %v203_v27 = vadd.s32 160, %v1536_v3  ;;  %1020 = vmatpush3.xpose.msk.msra.mxu0 %vm387_vm2, %v1345_v36  ;;  %v235_v30 = vadd.s32 416, %v1536_v3 }
  0xbd   : > { %1054 = vmatpush3.xpose.msk.msra.mxu1 %vm419_vm3, %v1345_v36  ;;  %v269_v28 = vadd.s32 %v1552_v16, %v204_v22  ;;  %v301_v29 = vadd.s32 %v1552_v16, %v236_v23  ;;  %v187_v31 = vadd.s32 32, %v1536_v3  ;;  %1021 = vmatprep.subr.msk.mxu0 %vm1761_vm4, %v1345_v36  ;;  %v253_v32 = vadd.s32 %v1552_v16, %v188_v25 }
  0xbe   : > { %1055 = vmatprep.subr.msk.mxu1 %vm434_vm5, %v1345_v36  ;;  %v285_v33 = vadd.s32 %v1552_v16, %v220_v26  ;;  %v268_v34 = vadd.s32 %v1552_v16, %v203_v27  ;;  %v219_v35 = vadd.s32 288, %v1536_v3  ;;  %v300_v39 = vadd.s32 %v1552_v16, %v235_v30 }
  0xbf   : > { %v333_v37 = vcvt.s32.f32 %v269_v28  ;;  %v365_v38 = vcvt.s32.f32 %v301_v29  ;;  %v252_v40 = vadd.s32 %v1552_v16, %v187_v31  ;;  %v317_v41 = vcvt.s32.f32 %v253_v32 }
  0xc0   : > { %v349_v42 = vcvt.s32.f32 %v285_v33  ;;  %v332_v43 = vcvt.s32.f32 %v268_v34  ;;  %v284_v44 = vadd.s32 %v1552_v16, %v219_v35  ;;  %1022 = vmatpush3.xpose.msk.msra.mxu0 %vm1767_vm6, %v1345_v36  ;;  %v364_v45 = vcvt.s32.f32 %v300_v39 }
  0xc1   : > { %1056 = vmatpush3.xpose.msk.msra.mxu1 %vm1774_vm7, %v1345_v36  ;;  %vm401_vm8 = vcmp.eq.f32.partialorder %v1547_v12, %v333_v37  ;;  %vm433_vm9 = vcmp.eq.f32.partialorder %v1547_v12, %v365_v38  ;;  %v316_v46 = vcvt.s32.f32 %v252_v40  ;;  %vm385_vm10 = vcmp.eq.f32.partialorder %v1547_v12, %v317_v41  ;;  %v572_v40 = vld [vmem:[%s1524_s26] sm:$0xff]  ;;  %v574_v41 = vld [vmem:[%s1524_s26 + $0x10] sm:$0xff] }
  0xc2   : > { %1023 = vmatprep.subr.msk.mxu0 %vm401_vm8, %v1345_v36  ;;  %1057 = vmatprep.subr.msk.mxu1 %vm433_vm9, %v1345_v36  ;;  %vm417_vm11 = vcmp.eq.f32.partialorder %v1547_v12, %v349_v42  ;;  %vm1811_vm12 = vcmp.eq.f32.partialorder %v1547_v12, %v332_v43  ;;  %v348_v48 = vcvt.s32.f32 %v284_v44  ;;  %vm432_vm13 = vcmp.eq.f32.partialorder %v1547_v12, %v364_v45  ;;  %v573_v44 = vld [vmem:[%s1524_s26 + $0x8] sm:$0xff]  ;;  %v575_v45 = vld [vmem:[%s1524_s26 + $0x18] sm:$0xff] }
  0xc3   : > { %vm1817_vm14 = vcmp.eq.f32.partialorder %v1547_v12, %v316_v46  ;;  %v202_v50 = vadd.s32 152, %v1536_v3  ;;  %v234_v51 = vadd.s32 408, %v1536_v3  ;;  %v186_v53 = vadd.s32 24, %v1536_v3 }
  0xc4   : > { %vm1824_vm15 = vcmp.eq.f32.partialorder %v1547_v12, %v348_v48  ;;  %v218_v54 = vadd.s32 280, %v1536_v3  ;;  %v201_v55 = vadd.s32 144, %v1536_v3  ;;  %1024 = vmatpush3.xpose.msk.msra.mxu0 %vm385_vm10, %v1345_v36  ;;  %v233_v58 = vadd.s32 400, %v1536_v3 }
  0xc5   : > { %1058 = vmatpush3.xpose.msk.msra.mxu1 %vm417_vm11, %v1345_v36  ;;  %v267_v56 = vadd.s32 %v1552_v16, %v202_v50  ;;  %v299_v57 = vadd.s32 %v1552_v16, %v234_v51  ;;  %v185_v59 = vadd.s32 16, %v1536_v3  ;;  %1025 = vmatprep.subr.msk.mxu0 %vm1811_vm12, %v1345_v36  ;;  %v251_v60 = vadd.s32 %v1552_v16, %v186_v53 }
  0xc6   : > { %1059 = vmatprep.subr.msk.mxu1 %vm432_vm13, %v1345_v36  ;;  %v283_v61 = vadd.s32 %v1552_v16, %v218_v54  ;;  %v266_v62 = vadd.s32 %v1552_v16, %v201_v55  ;;  %v217_v63 = vadd.s32 272, %v1536_v3  ;;  %v298_v4 = vadd.s32 %v1552_v16, %v233_v58 }
  0xc7   : > { %v331_v0 = vcvt.s32.f32 %v267_v56  ;;  %v363_v2 = vcvt.s32.f32 %v299_v57  ;;  %v250_v5 = vadd.s32 %v1552_v16, %v185_v59  ;;  %v315_v6 = vcvt.s32.f32 %v251_v60 }
  0xc8   : > { %v347_v7 = vcvt.s32.f32 %v283_v61  ;;  %v330_v8 = vcvt.s32.f32 %v266_v62  ;;  %v282_v9 = vadd.s32 %v1552_v16, %v217_v63  ;;  %1026 = vmatpush3.xpose.msk.msra.mxu0 %vm1817_vm14, %v1345_v36  ;;  %v362_v10 = vcvt.s32.f32 %v298_v4 }
  0xc9   : > { %1060 = vmatpush3.xpose.msk.msra.mxu1 %vm1824_vm15, %v1345_v36  ;;  %vm399_vm0 = vcmp.eq.f32.partialorder %v1547_v12, %v331_v0  ;;  %vm431_vm1 = vcmp.eq.f32.partialorder %v1547_v12, %v363_v2  ;;  %v314_v11 = vcvt.s32.f32 %v250_v5  ;;  %vm383_vm2 = vcmp.eq.f32.partialorder %v1547_v12, %v315_v6 }
  0xca   : > { %1027 = vmatprep.subr.msk.mxu0 %vm399_vm0, %v1345_v36  ;;  %1061 = vmatprep.subr.msk.mxu1 %vm431_vm1, %v1345_v36  ;;  %vm415_vm3 = vcmp.eq.f32.partialorder %v1547_v12, %v347_v7  ;;  %vm1861_vm4 = vcmp.eq.f32.partialorder %v1547_v12, %v330_v8  ;;  %v346_v14 = vcvt.s32.f32 %v282_v9  ;;  %vm430_vm5 = vcmp.eq.f32.partialorder %v1547_v12, %v362_v10 }
  0xcb   : > { %vm1867_vm6 = vcmp.eq.f32.partialorder %v1547_v12, %v314_v11  ;;  %v200_v17 = vadd.s32 136, %v1536_v3  ;;  %v232_v18 = vadd.s32 392, %v1536_v3  ;;  %v184_v20 = vadd.s32 8, %v1536_v3 }
  0xcc   : > { %vm1874_vm7 = vcmp.eq.f32.partialorder %v1547_v12, %v346_v14  ;;  %v216_v21 = vadd.s32 264, %v1536_v3  ;;  %v199_v22 = vadd.s32 128, %v1536_v3  ;;  %1028 = vmatpush3.xpose.msk.msra.mxu0 %vm383_vm2, %v1345_v36  ;;  %v231_v25 = vadd.s32 384, %v1536_v3 }
  0xcd   : > { %1062 = vmatpush3.xpose.msk.msra.mxu1 %vm415_vm3, %v1345_v36  ;;  %v265_v23 = vadd.s32 %v1552_v16, %v200_v17  ;;  %v297_v24 = vadd.s32 %v1552_v16, %v232_v18  ;;  %v248_v26 = vadd.s32 %v1552_v16, %v1536_v3  ;;  %1029 = vmatprep.subr.msk.mxu0 %vm1861_vm4, %v1345_v36  ;;  %v215_v30 = vadd.s32 256, %v1536_v3 }
  0xce   : > { %1063 = vmatprep.subr.msk.mxu1 %vm430_vm5, %v1345_v36  ;;  %v249_v27 = vadd.s32 %v1552_v16, %v184_v20  ;;  %v281_v28 = vadd.s32 %v1552_v16, %v216_v21  ;;  %v264_v29 = vadd.s32 %v1552_v16, %v199_v22  ;;  %v296_v33 = vadd.s32 %v1552_v16, %v231_v25 }
  0xcf   : > { %v329_v31 = vcvt.s32.f32 %v265_v23  ;;  %v361_v32 = vcvt.s32.f32 %v297_v24  ;;  %v280_v38 = vadd.s32 %v1552_v16, %v215_v30  ;;  %v312_v16 = vcvt.s32.f32 %v248_v26 }
  0xd0   : > { %v313_v34 = vcvt.s32.f32 %v249_v27  ;;  %v345_v35 = vcvt.s32.f32 %v281_v28  ;;  %v328_v37 = vcvt.s32.f32 %v264_v29  ;;  %1030 = vmatpush3.xpose.msk.msra.mxu0 %vm1867_vm6, %v1345_v36  ;;  %v360_v3 = vcvt.s32.f32 %v296_v33 }
  0xd1   : > { %1064 = vmatpush3.xpose.msk.msra.mxu1 %vm1874_vm7, %v1345_v36  ;;  %vm397_vm8 = vcmp.eq.f32.partialorder %v1547_v12, %v329_v31  ;;  %vm429_vm9 = vcmp.eq.f32.partialorder %v1547_v12, %v361_v32  ;;  %v344_v39 = vcvt.s32.f32 %v280_v38  ;;  %vm380_vm14 = vcmp.eq.f32.partialorder %v1547_v12, %v312_v16 }
  0xd2   : > { %1031 = vmatprep.subr.msk.mxu0 %vm397_vm8, %v1345_v36  ;;  %1065 = vmatprep.subr.msk.mxu1 %vm429_vm9, %v1345_v36  ;;  %vm381_vm10 = vcmp.eq.f32.partialorder %v1547_v12, %v313_v34  ;;  %vm413_vm11 = vcmp.eq.f32.partialorder %v1547_v12, %v345_v35  ;;  %vm396_vm12 = vcmp.eq.f32.partialorder %v1547_v12, %v328_v37 }
  0xd3   : > { %vm428_vm13 = vcmp.eq.f32.partialorder %v1547_v12, %v360_v3  ;;  %vm412_vm15 = vcmp.eq.f32.partialorder %v1547_v12, %v344_v39 }
  0xd4   : > { %1032 = vmatpush3.xpose.msk.msra.mxu0 %vm381_vm10, %v1345_v36 }
  0xd5   : > { %1066 = vmatpush3.xpose.msk.msra.mxu1 %vm413_vm11, %v1345_v36  ;;  %1033 = vmatprep.subr.msk.mxu0 %vm396_vm12, %v1345_v36 }
  0xd6   : > { %1067 = vmatprep.subr.msk.mxu1 %vm428_vm13, %v1345_v36 }
  0xd8   : > { %1034 = vmatpush3.xpose.msk.msra.mxu0 %vm380_vm14, %v1345_v36 }
  0xd9   : > { %1068 = vmatpush3.xpose.msk.msra.mxu1 %vm412_vm15, %v1345_v36 }
  0xdb   : > { %1036 = vmatmul.mubr.f32.vlgmr.msra.gmra.mxu0 %v1531_v1 }
  0xdc   : > { %1070 = vmatmul.mubr.f32.vlgmr.msra.gmra.mxu1 %v1531_v1 }
 0x19b   : > { %v642_v42 = vpop.f32.mrf.mxu0 }
 0x19c   : > { %v713_v43 = vpop.f32.mrf.mxu1  ;;  %v718_v46 = vadd.f32 %v642_v42, %v572_v40 }
 0x19d   : > { %v720_v47 = vadd.f32 %v713_v43, %v574_v41  ;;  %v644_v12 = vpop.f32.mrf.mxu0 }
 0x19e   : > { %v715_v48 = vpop.f32.mrf.mxu1  ;;  %722 = vst [vmem:[%s1524_s26] sm:$0xff] %v718_v46  ;;  %v719_v49 = vadd.f32 %v644_v12, %v573_v44 }
 0x19f   : > { %724 = vst [vmem:[%s1524_s26 + $0x10] sm:$0xff] %v720_v47  ;;  %v721_v36 = vadd.f32 %v715_v48, %v575_v45 }
 0x1a0   : > { %723 = vst [vmem:[%s1524_s26 + $0x8] sm:$0xff] %v719_v49 }
 0x1a1   : > { %725 = vst [vmem:[%s1524_s26 + $0x18] sm:$0xff] %v721_v36 }
 0x1a2 PF: > { %s726_s15 = sld [smem:[#allocation7 + %s1431_s22]] }
 0x1a8   : > { %p996_p7 = scmp.ne.s32.totalorder %s726_s15, 1 }
 0x1aa   : > { %730 = sbr.rel (%p996_p7) target bundleno = 456 (0x1c8), region = 40 }
 0x1af   : > { %v731_v1 = vld [vmem:[%s1524_s26] sm:$0xff]  ;;  %v732_v50 = vld [vmem:[%s1524_s26 + $0x8] sm:$0xff]  ;;  %v733_v51 = vld [vmem:[%s1524_s26 + $0x10] sm:$0xff]  ;;  %v747_v57 = vlaneseq }
 0x1b0   : > { %v735_v52 = vmax.f32 %v731_v1, 1.0  ;;  %v736_v53 = vmax.f32 %v732_v50, 1.0  ;;  %v737_v54 = vmax.f32 %v733_v51, 1.0  ;;  %v734_v55 = vld [vmem:[%s1524_s26 + $0x18] sm:$0xff] }
 0x1b1   : > { %v738_v56 = vmax.f32 %v734_v55, 1.0  ;;  %v748_v58 = vshrl.u32 %v747_v57, 7 }
 0x1b2   : > { %1154 = vrcp.f32 %v735_v52 }
 0x1b3   : > { %1156 = vrcp.f32 %v736_v53  ;;  %v749_v59 = vsub.s32 4, %v748_v58 }
 0x1b4   : > { %1158 = vrcp.f32 %v737_v54 }
 0x1b5   : > { %1160 = vrcp.f32 %v738_v56 }
 0x1bf   : > { %v1155_v60 = vpop.eup %1154 }
 0x1c0   : > { %v1157_v61 = vpop.eup %1156  ;;  %v750_v62 = vrot.slane %v1155_v60, %v749_v59 }
 0x1c1   : > { %v1159_v63 = vpop.eup %1158  ;;  %v754_v0 = vrot.slane %v1157_v61, %v749_v59 }
 0x1c2   : > { %v1161_v2 = vpop.eup %1160  ;;  %v763_v4 = vmul.f32 %v750_v62, %v731_v1  ;;  %v758_v5 = vrot.slane %v1159_v63, %v749_v59 }
 0x1c3   : > { %v764_v6 = vmul.f32 %v754_v0, %v732_v50  ;;  %v762_v7 = vrot.slane %v1161_v2, %v749_v59 }
 0x1c4   : > { %767 = vst [vmem:[%s1524_s26] sm:$0xff] %v763_v4  ;;  %v765_v8 = vmul.f32 %v758_v5, %v733_v51 }
 0x1c5   : > { %768 = vst [vmem:[%s1524_s26 + $0x8] sm:$0xff] %v764_v6  ;;  %v766_v9 = vmul.f32 %v762_v7, %v734_v55 }
 0x1c6   : > { %769 = vst [vmem:[%s1524_s26 + $0x10] sm:$0xff] %v765_v8 }
 0x1c7   : > { %770 = vst [vmem:[%s1524_s26 + $0x18] sm:$0xff] %v766_v9 }
 0x1c8 PF: > { %p2045_p12 = scmp.ne.s32.totalorder %s1999_s9, 0  ;;  %s787_s18 = sshll.u32 %s1524_s26, 4  ;;  %s788_s18 = int_to_ptr.vmem [resolvable:$true] %s787_s18 }
 0x1c9   : > { %s772_s2 = scalar_lea.sflag [#allocation10], %s159_s13  ;;  %s1246_s12 = scalar_lea.vmem %s788_s18, 512 }
 0x1ca   : > { %s1075_s23 = scalar_select %p2045_p12, [#allocation3], [#allocation13] }
 0x1cb   : > { %s2059_s22 = smov (!%p2045_p12, %s1431_s22), 0  ;;  %p1247_p13 = scmp.ne.s32.totalorder %s788_s18, %s1246_s12 }
 0x1cc   : > { %s779_s11 = sld [smem:[%s1075_s23 + %s2059_s22]]  ;;  %s1346_s14 = smov [#allocation11]  }
 0x1cd   : > { %p1248_p3 = pnand %p1247_p13, %p2045_p12  ;;  %s1250_s25 = sshll.u32 %s1346_s14, 4  ;;  %s1251_s25 = int_to_ptr.vmem [resolvable:$false] %s1250_s25 }
 0x1ce   : > { %s1252_s30 = scalar_lea.vmem %s1251_s25, 1024  ;;  %p1253_p6 = scmp.lt.s32.totalorder %s788_s18, %s1251_s25 }
 0x1cf   : > { %p1249_p5 = pneg %p1248_p3  ;;  %p1254_p8 = scmp.lt.s32.totalorder %s1252_s30, %s1246_s12 }
 0x1d1   : > { %p1255_p9 = por %p1254_p8, %p1253_p6 }
 0x1d2   : > { %s1002_s27 = sshll.u32 %s779_s11, 9 }
 0x1d3   : > { %s785_s8 = scalar_lea.hbm %s1990_s6, %s1002_s27  ;;  %p1256_p10 = pnand %p1255_p9, %p1249_p5 }
 0x1d5   : > { %1259 = shalt.err (!%p1256_p10)
}
 0x1d6   : > { %s1260_s22 = scalar_lea.hbm %s785_s8, 512  ;;  %s1264_s28 = scalar_lea.hbm %s1990_s6, 1536 }
 0x1d7   : > { %p1261_p0 = scmp.ne.s32.totalorder %s785_s8, %s1260_s22  ;;  %p1265_p11 = scmp.lt.s32.totalorder %s785_s8, %s1990_s6 }
 0x1d8   : > { %p1266_p2 = scmp.lt.s32.totalorder %s1264_s28, %s1260_s22 }
 0x1d9   : > { %p1262_p1 = pnand %p1261_p0, %p2045_p12 }
 0x1da   : > { %p1267_p7 = por %p1266_p2, %p1265_p11 }
 0x1db   : > { %p1263_p4 = pneg %p1262_p1 }
 0x1dd   : > { %p1268_p13 = pnand %p1267_p7, %p1263_p4 }
 0x1df   : > { %1271 = shalt.err (!%p1268_p13)
}
 0x1e0   : > { %1077 = dma.vmem_to_hbm [thread:$0]  (%p2045_p12), %s788_s18, 512, %s785_s8, %s772_s2  }
 0x1e1 PF: > { %p1090_p3 = scmp.ge.s32.totalorder %s1336_s21, 2  ;;  %s799_s23 = sand.u32 1, %s1312_s16  }
 0x1e2   : > { %p2046_p5 = scmp.ne.s32.totalorder %s2000_s10, 0  ;;  %s800_s11 = scalar_lea.sflag [#allocation10], %s799_s23 }
 0x1e4   : > { %p1086_p6 = pnand %p1090_p3, %p2046_p5 }
 0x1e6   : > { %p1087_p8 = pneg %p1086_p6 }
 0x1e8   : > { %1307 = dma.done.wait (%p1087_p8), %s800_s11, 512  }
 0x1e9   : > { %1309 = vsyncadd (%p1087_p8), %s800_s11, 4294966784  ;;  %p39_p12 = scmp.ge.s32.totalorder %s1435_s24, 8   ;;  %s2047_s16 = smov %s1316_s4 }
 0x1ea   : > { %s2048_s4 = smov %s1320_s17  ;;  %s2049_s17 = smov %s1475_s3 }
 0x1eb   : > { %s2050_s18 = smov %s1328_s19  ;;  %s2051_s19 = smov %s1332_s20 }
 0x1ec   : > { %s2052_s20 = smov %s1466_s1  ;;  %s2053_s21 = smov %s1435_s24 }
 0x1ed   :  { %41 = sbr.rel (!%p39_p12) target bundleno = 53 (0x35), region = 81 }
 0x1f2   :  { %805 = vsyncpa [#allocation9], 1 }
 0x1f3   :  { %807 = vsyncpa [#allocation9 + $0x1], 1 }
 0x1f4   :  { %808 = vsyncpa [#allocation10], 1 }
 0x1f5   :  { %810 = vsyncpa [#allocation10 + $0x1], 1 }

</bundles_post_ra>
